<compile_context>
chip_gen: v5e
topology: v5e:2x2
jax: 0.10.0
libtpu: 0.0.40
codegen_flags: <defaults>
</compile_context>

<pallas_src>
import functools

import jax
import jax.numpy as jnp
from jax.experimental import pallas as pl
from jax.experimental.pallas import tpu as pltpu


# ------------------------------- helpers ----------------------------------- #

def _round_up(x, m):
    return (x + m - 1) // m * m


def _pad2(x, rows, cols):
    pr, pc = rows - x.shape[0], cols - x.shape[1]
    if pr == 0 and pc == 0:
        return x
    return jnp.pad(x, ((0, pr), (0, pc)))


_VMEM_LIMIT_CACHE = []


def _vmem_limit_bytes():
    # Chip-aware scoped VMEM limit: ~60% of physical, capped at 64 MiB
    # (v5e/v6e: 128 MiB phys -> 64 MiB; v7x: 64 MiB phys -> ~38 MiB).
    if not _VMEM_LIMIT_CACHE:
        try:
            phys = int(pltpu.get_tpu_info().vmem_capacity_bytes)
        except Exception:
            phys = 64 * 1024 * 1024          # conservative (v7x-sized) fallback
        _VMEM_LIMIT_CACHE.append(min(64 * 1024 * 1024, (phys * 3) // 5))
    return _VMEM_LIMIT_CACHE[0]


def _compiler_params():
    return pltpu.CompilerParams(
        dimension_semantics=("parallel", "arbitrary"),
        vmem_limit_bytes=_vmem_limit_bytes())


def _sublane_align(dtype):
    # native sublane tiling: 8 for 32-bit, 16 for 16-bit, 32 for 8-bit
    return max(8, 32 // jnp.dtype(dtype).itemsize)


def _pick_anchor_tile(b, align):
    # Aim for >= 2 anchor blocks when B allows it (keeps both TCs busy on v7x),
    # cap the tile at 512 rows so contrast re-streaming stays amortized.
    b = max(int(b), 1)
    if b <= align:
        return align, align
    half = -(-b // 2)
    tb = min(512, _round_up(half, align))
    return tb, _round_up(b, tb)


def _pick_stream_tile(n, per_col_bytes, budget_bytes, max_tn=2048):
    # Largest lane-dense TN whose per-step VMEM footprint fits the budget, then
    # pad N up to a multiple of TN (padded columns handled in-kernel).
    n128 = _round_up(max(int(n), 1), 128)
    limit = min(n128, max(int(max_tn), 128))
    tn = 128
    cand = 256
    while cand <= limit and cand * per_col_bytes <= budget_bytes:
        tn = cand
        cand += 128
    return tn, _round_up(max(int(n), 1), tn)


# ----------------------------- Pallas kernels ------------------------------ #

def _supcon_kernel(*refs, has_lmask, n_valid, n_padded, tn, inv_temp, loss_scale):
    if has_lmask:
        (anchor_ref, contrast_ref, mask_ref, lmask_ref, loss_ref,
         m_sc, l_sc, s_sc, c_sc) = refs
    else:
        (anchor_ref, contrast_ref, mask_ref, loss_ref,
         m_sc, l_sc, s_sc, c_sc) = refs
        lmask_ref = None

    j = pl.program_id(1)
    needs_col_mask = (n_padded != n_valid)
    groups = tn // 128

    @pl.when(j == 0)
    def _init():
        m_sc[...] = jnp.full(m_sc.shape, -1e30, m_sc.dtype)
        l_sc[...] = jnp.zeros(l_sc.shape, l_sc.dtype)
        s_sc[...] = jnp.zeros(s_sc.shape, s_sc.dtype)
        c_sc[...] = jnp.zeros(c_sc.shape, c_sc.dtype)

    # (TB, C) x (C, TN) -> (TB, TN): MXU-natural orientation (K on RHS rows).
    adc = jax.lax.dot_general(
        anchor_ref[...], contrast_ref[...],
        dimension_numbers=(((1,), (0,)), ((), ())),
        preferred_element_type=jnp.float32) * inv_temp

    if needs_col_mask:
        col = jax.lax.broadcasted_iota(jnp.int32, adc.shape, 1) + j * tn
        adc = jnp.where(col < n_valid, adc, -1e30)   # padded columns -> -1e30

    pos = mask_ref[...].astype(jnp.float32)          # int8 0/1, zero-padded
    if has_lmask:
        lm = lmask_ref[...].astype(jnp.float32)      # int8 0/1, zero-padded
        pos = pos * lm
    else:
        lm = None

    # Lane-wide online softmax: only per-lane VPU/EUP work here; cross-lane
    # reductions are deferred to the finalize step.
    m_prev = m_sc[...]
    step_max = adc[:, 0:128]
    for g in range(1, groups):
        step_max = jnp.maximum(step_max, adc[:, g * 128:(g + 1) * 128])
    m_new = jnp.maximum(m_prev, step_max)
    alpha = jnp.exp(m_prev - m_new)

    p_acc = jnp.zeros_like(m_new)
    s_acc = jnp.zeros_like(m_new)
    c_acc = jnp.zeros_like(m_new)
    for g in range(groups):
        chunk = adc[:, g * 128:(g + 1) * 128]
        e = jnp.exp(chunk - m_new)
        if lm is not None:
            e = e * lm[:, g * 128:(g + 1) * 128]
        pg = pos[:, g * 128:(g + 1) * 128]
        p_acc = p_acc + e
        s_acc = s_acc + pg * chunk                   # pg==0 on padded cols -> 0*(-1e30)=0
        c_acc = c_acc + pg

    l_sc[...] = alpha * l_sc[...] + p_acc
    s_sc[...] = s_sc[...] + s_acc
    c_sc[...] = c_sc[...] + c_acc
    m_sc[...] = m_new

    @pl.when(j == pl.num_programs(1) - 1)
    def _finalize():
        m_lane = m_sc[...]
        m_row = jnp.max(m_lane, axis=1, keepdims=True)
        # dead lanes (no valid column ever) have m_lane=-1e30 -> exp(...)==0 kills them
        l_row = jnp.sum(l_sc[...] * jnp.exp(m_lane - m_row), axis=1, keepdims=True)
        s_row = jnp.sum(s_sc[...], axis=1, keepdims=True)
        c_row = jnp.sum(c_sc[...], axis=1, keepdims=True)
        log_denom = m_row + jnp.log(l_row + 1e-12)
        mean_log_prob_pos = (s_row - c_row * log_denom) / (c_row + 1e-12)
        loss_ref[...] = (-loss_scale * mean_log_prob_pos).astype(loss_ref.dtype)


def _moco_kernel(q_ref, k_ref, queue_ref, loss_ref, m_sc, l_sc, pos_sc,
                 *, k_valid, k_padded, tq, inv_temp):
    j = pl.program_id(1)
    groups = tq // 128

    @pl.when(j == 0)
    def _init():
        l_pos = jnp.sum(q_ref[...].astype(jnp.float32) * k_ref[...].astype(jnp.float32),
                        axis=1, keepdims=True) * inv_temp
        pos_sc[...] = l_pos
        m_sc[...] = jnp.full(m_sc.shape, -1e30, m_sc.dtype)
        l_sc[...] = jnp.zeros(l_sc.shape, l_sc.dtype)

    # (TB, C) x (C, TQ) -> (TB, TQ): MXU-natural orientation.
    l_neg = jax.lax.dot_general(
        q_ref[...], queue_ref[...],
        dimension_numbers=(((1,), (0,)), ((), ())),
        preferred_element_type=jnp.float32) * inv_temp

    if k_padded != k_valid:
        col = jax.lax.broadcasted_iota(jnp.int32, l_neg.shape, 1) + j * tq
        l_neg = jnp.where(col < k_valid, l_neg, -1e30)

    m_prev = m_sc[...]
    step_max = l_neg[:, 0:128]
    for g in range(1, groups):
        step_max = jnp.maximum(step_max, l_neg[:, g * 128:(g + 1) * 128])
    m_new = jnp.maximum(m_prev, step_max)
    alpha = jnp.exp(m_prev - m_new)

    acc = jnp.zeros_like(m_new)
    for g in range(groups):
        acc = acc + jnp.exp(l_neg[:, g * 128:(g + 1) * 128] - m_new)
    l_sc[...] = alpha * l_sc[...] + acc
    m_sc[...] = m_new

    @pl.when(j == pl.num_programs(1) - 1)
    def _finalize():
        m_lane = m_sc[...]
        pos = pos_sc[...]
        m_row = jnp.max(m_lane, axis=1, keepdims=True)
        m_tot = jnp.maximum(m_row, pos)
        l_tot = (jnp.sum(l_sc[...] * jnp.exp(m_lane - m_tot), axis=1, keepdims=True)
                 + jnp.exp(pos - m_tot))
        # cross_entropy([l_pos, l_neg], label=0) = logsumexp - l_pos
        loss_ref[...] = (m_tot + jnp.log(l_tot) - pos).astype(loss_ref.dtype)


# ------------------------------ Python wrapper ------------------------------ #

def supcon_loss(features, mask=None, neg_mask=None, batch_size=-1,
                other_features=None, temperature=0.07, base_temperature=0.07,
                _max_stream_tile=2048):
    """JAX/Pallas equivalent of SupConLoss.forward (forward pass only)."""
    features = jnp.asarray(features)            # keep input dtype (bf16 stays bf16)
    inv_temp = 1.0 / float(temperature)
    budget = _vmem_limit_bytes() // 3           # streamed-tile + intermediates budget

    if mask is not None:
        anchor = features[:batch_size]          # NB: batch_size=-1 drops the last row,
        contrast = (features if other_features  # matching the torch slicing semantics.
                    is None else jnp.asarray(other_features))
        B, C = anchor.shape
        N = contrast.shape[0]

        # Masks streamed as int8 (binary masks assumed — standard SupCon usage).
        mask_i8 = jnp.asarray(mask).astype(jnp.int8)
        if neg_mask is not None:
            # torch.scatter(neg_mask, 1, arange(B).view(-1,1), 0): zero column i of row i
            lmask_i8 = jnp.asarray(neg_mask).astype(jnp.int8).at[
                jnp.arange(B), jnp.arange(B)].set(0)
        else:
            lmask_i8 = None                     # all-ones logits_mask: never streamed

        C_pad = _round_up(C, 128)
        feat_isz = jnp.dtype(features.dtype).itemsize
        TB, B_pad = _pick_anchor_tile(B, max(_sublane_align(features.dtype), 32))
        n_streams = 1 if lmask_i8 is None else 2
        per_col = 2 * C_pad * feat_isz + 2 * TB * n_streams + 4 * TB * 4
        TN, N_pad = _pick_stream_tile(N, per_col, budget, _max_stream_tile)

        inputs = [_pad2(anchor, B_pad, C_pad),
                  _pad2(contrast.T, C_pad, N_pad),        # (C, N): MXU-natural RHS
                  _pad2(mask_i8, B_pad, N_pad)]
        in_specs = [
            pl.BlockSpec((TB, C_pad), lambda i, j: (i, 0)),   # anchor tile (resident per i)
            pl.BlockSpec((C_pad, TN), lambda i, j: (0, j)),   # streamed contrast tile
            pl.BlockSpec((TB, TN), lambda i, j: (i, j)),      # streamed int8 positive mask
        ]
        if lmask_i8 is not None:
            inputs.append(_pad2(lmask_i8, B_pad, N_pad))
            in_specs.append(pl.BlockSpec((TB, TN), lambda i, j: (i, j)))

        kernel = functools.partial(
            _supcon_kernel,
            has_lmask=lmask_i8 is not None,
            n_valid=N, n_padded=N_pad, tn=TN,
            inv_temp=inv_temp,
            loss_scale=float(temperature) / float(base_temperature))

        per_row = pl.pallas_call(
            kernel,
            out_shape=jax.ShapeDtypeStruct((B_pad, 1), jnp.float32),
            grid_spec=pltpu.PrefetchScalarGridSpec(
                num_scalar_prefetch=0,
                grid=(B_pad // TB, N_pad // TN),
                in_specs=in_specs,
                out_specs=pl.BlockSpec((TB, 1), lambda i, j: (i, 0)),
                scratch_shapes=[pltpu.VMEM((TB, 128), jnp.float32)] * 4),
            compiler_params=_compiler_params(),
        )(*inputs)
        return jnp.mean(per_row[:B, 0])

    else:
        q = features[:batch_size]
        k = features[batch_size:batch_size * 2]
        queue = features[batch_size * 2:]
        B, C = q.shape
        K = queue.shape[0]

        C_pad = _round_up(C, 128)
        feat_isz = jnp.dtype(features.dtype).itemsize
        TB, B_pad = _pick_anchor_tile(B, _sublane_align(features.dtype))
        per_col = 2 * C_pad * feat_isz + 4 * TB * 4
        TQ, K_pad = _pick_stream_tile(K, per_col, budget, _max_stream_tile)

        kernel = functools.partial(_moco_kernel, k_valid=K, k_padded=K_pad,
                                   tq=TQ, inv_temp=inv_temp)

        per_row = pl.pallas_call(
            kernel,
            out_shape=jax.ShapeDtypeStruct((B_pad, 1), jnp.float32),
            grid_spec=pltpu.PrefetchScalarGridSpec(
                num_scalar_prefetch=0,
                grid=(B_pad // TB, K_pad // TQ),
                in_specs=[pl.BlockSpec((TB, C_pad), lambda i, j: (i, 0)),
                          pl.BlockSpec((TB, C_pad), lambda i, j: (i, 0)),
                          pl.BlockSpec((C_pad, TQ), lambda i, j: (0, j))],
                out_specs=pl.BlockSpec((TB, 1), lambda i, j: (i, 0)),
                scratch_shapes=[pltpu.VMEM((TB, 128), jnp.float32),
                                pltpu.VMEM((TB, 128), jnp.float32),
                                pltpu.VMEM((TB, 1), jnp.float32)]),
            compiler_params=_compiler_params(),
        )(_pad2(q, B_pad, C_pad), _pad2(k, B_pad, C_pad),
          _pad2(queue.T, C_pad, K_pad))
        return jnp.mean(per_row[:B, 0])


# ------------------------------ pure-JAX refs ------------------------------- #

def _ref_supcon(features, mask, neg_mask, batch_size,
                temperature=0.07, base_temperature=0.07, other_features=None):
    anchor = features[:batch_size]
    contrast = features if other_features is None else other_features
    adc = (anchor @ contrast.T) / temperature
    logits = adc - jnp.max(adc, axis=1, keepdims=True)
    if neg_mask is None:
        logits_mask = jnp.ones_like(mask)
    else:
        logits_mask = neg_mask.at[jnp.arange(batch_size), jnp.arange(batch_size)].set(0.0)
    m = mask * logits_mask
    exp_logits = jnp.exp(logits) * logits_mask
    log_prob = logits - jnp.log(exp_logits.sum(1, keepdims=True) + 1e-12)
    mlpp = (m * log_prob).sum(1) / (m.sum(1) + 1e-12)
    return jnp.mean(-(temperature / base_temperature) * mlpp)


def _ref_moco(features, batch_size, temperature=0.07):
    q = features[:batch_size]
    k = features[batch_size:2 * batch_size]
    queue = features[2 * batch_size:]
    l_pos = jnp.sum(q * k, axis=1, keepdims=True)
    l_neg = q @ queue.T
    logits = jnp.concatenate([l_pos, l_neg], axis=1) / temperature
    lse = jax.scipy.special.logsumexp(logits, axis=1)
    return jnp.mean(lse - logits[:, 0])


# ---------------------------------- main ------------------------------------ #

if __name__ == "__main__":
    key = jax.random.PRNGKey(0)
    keys = jax.random.split(key, 10)

    checks = []

    # Case A: small, single padded stream tile (N = 24 -> 128).
    B, C = 8, 128
    N = 3 * B
    feats = jax.random.normal(keys[0], (N, C), jnp.float32)
    feats = feats / jnp.linalg.norm(feats, axis=1, keepdims=True)
    labels = jax.random.randint(keys[1], (N,), 0, 4)
    mask = (labels[:B, None] == labels[None, :]).astype(jnp.float32)       # (B, N)
    neg_mask = jax.random.bernoulli(keys[2], 0.7, (B, N)).astype(jnp.float32)

    checks.append((supcon_loss(feats, mask=mask, neg_mask=None, batch_size=B),
                   _ref_supcon(feats, mask, None, B)))
    checks.append((supcon_loss(feats, mask=mask, neg_mask=neg_mask, batch_size=B),
                   _ref_supcon(feats, mask, neg_mask, B)))
    checks.append((supcon_loss(feats, mask=None, batch_size=B),
                   _ref_moco(feats, B)))

    # Case A2: other_features path (M = 40 contrast rows).
    M = 40
    other = jax.random.normal(keys[3], (M, C), jnp.float32)
    other = other / jnp.linalg.norm(other, axis=1, keepdims=True)
    labels_o = jax.random.randint(keys[4], (M,), 0, 4)
    mask_o = (labels[:B, None] == labels_o[None, :]).astype(jnp.float32)
    checks.append((supcon_loss(feats, mask=mask_o, neg_mask=None, batch_size=B,
                               other_features=other),
                   _ref_supcon(feats, mask_o, None, B, other_features=other)))

    # Case B: larger contrast set; budget-driven single 384-wide tile, MoCo queue 352.
    B2, C2 = 16, 128
    N2 = 384
    feats2 = jax.random.normal(keys[5], (N2, C2), jnp.float32)
    feats2 = feats2 / jnp.linalg.norm(feats2, axis=1, keepdims=True)
    labels2 = jax.random.randint(keys[6], (N2,), 0, 5)
    mask2 = (labels2[:B2, None] == labels2[None, :]).astype(jnp.float32)
    neg_mask2 = jax.random.bernoulli(keys[7], 0.6, (B2, N2)).astype(jnp.float32)

    checks.append((supcon_loss(feats2, mask=mask2, neg_mask=None, batch_size=B2),
                   _ref_supcon(feats2, mask2, None, B2)))
    checks.append((supcon_loss(feats2, mask=mask2, neg_mask=neg_mask2, batch_size=B2),
                   _ref_supcon(feats2, mask2, neg_mask2, B2)))
    checks.append((supcon_loss(feats2, mask=None, batch_size=B2),
                   _ref_moco(feats2, B2)))

    # Case C: same data with the stream tile capped at 128 -> exercises multi-step
    # online (lane-wide flash-style) accumulation across the "arbitrary" grid axis.
    checks.append((supcon_loss(feats2, mask=mask2, neg_mask=neg_mask2, batch_size=B2,
                               _max_stream_tile=128),
                   _ref_supcon(feats2, mask2, neg_mask2, B2)))
    checks.append((supcon_loss(feats2, mask=None, batch_size=B2, _max_stream_tile=128),
                   _ref_moco(feats2, B2)))

    # Case D: non-128 feature dim (C = 64, zero-padded to 128 inside the wrapper).
    B3, C3, N3 = 8, 64, 40
    feats3 = jax.random.normal(keys[8], (N3, C3), jnp.float32)
    feats3 = feats3 / jnp.linalg.norm(feats3, axis=1, keepdims=True)
    labels3 = jax.random.randint(keys[9], (N3,), 0, 3)
    mask3 = (labels3[:B3, None] == labels3[None, :]).astype(jnp.float32)
    checks.append((supcon_loss(feats3, mask=mask3, neg_mask=None, batch_size=B3),
                   _ref_supcon(feats3, mask3, None, B3)))
    checks.append((supcon_loss(feats3, mask=None, batch_size=B3),
                   _ref_moco(feats3, B3)))

    jax.block_until_ready([c[0] for c in checks])
    for idx, (got, want) in enumerate(checks):
        assert jnp.allclose(got, want, rtol=1e-4, atol=1e-4), (idx, got, want)

    print("KERNEL_OK")
</pallas_src>

<mosaic_0001>
module attributes {stable_mosaic.version = 11 : i64} {
  func.func @_supcon_kernel(%arg0: i32, %arg1: i32, %arg2: memref<32x128xf32, #tpu.memory_space<vmem>>, %arg3: memref<128x128xf32, #tpu.memory_space<vmem>>, %arg4: memref<32x128xi8, #tpu.memory_space<vmem>>, %arg5: memref<32x1xf32, #tpu.memory_space<vmem>>, %arg6: memref<32x128xf32, #tpu.memory_space<vmem>>, %arg7: memref<32x128xf32, #tpu.memory_space<vmem>>, %arg8: memref<32x128xf32, #tpu.memory_space<vmem>>, %arg9: memref<32x128xf32, #tpu.memory_space<vmem>>) attributes {dimension_semantics = [#tpu.dimension_semantics<parallel>, #tpu.dimension_semantics<arbitrary>], iteration_bounds = array<i64: 1, 1>, scalar_prefetch = 0 : i64, scratch_operands = 4 : i64, tpu.core_type = #tpu.core_type<tc>, window_params = [{transform_indices = @transform_0, window_bounds = array<i64: 32, 128>}, {transform_indices = @transform_1, window_bounds = array<i64: 128, 128>}, {transform_indices = @transform_2, window_bounds = array<i64: 32, 128>}, {transform_indices = @transform_3, window_bounds = array<i64: 32, 1>}]} {
    %c0_i32 = arith.constant 0 : i32
    %0 = arith.cmpi eq, %arg1, %c0_i32 : i32
    %1 = arith.extui %0 : i1 to i32
    %c0_i32_0 = arith.constant 0 : i32
    %2 = arith.cmpi ne, %1, %c0_i32_0 : i32
    scf.if %2 {
      %cst_29 = arith.constant -1.000000e+30 : f32
      %45 = vector.broadcast %cst_29 : f32 to vector<32x128xf32>
      %c0_30 = arith.constant 0 : index
      %c0_31 = arith.constant 0 : index
      %46 = vector.load %arg6[%c0_30, %c0_31] : memref<32x128xf32, #tpu.memory_space<vmem>>, vector<32x128xf32>
      tpu.vector_store %arg6[%c0_30, %c0_31], %45 {strides = array<i32>} : memref<32x128xf32, #tpu.memory_space<vmem>>, vector<32x128xf32>,
      %cst_32 = arith.constant 0.000000e+00 : f32
      %47 = vector.broadcast %cst_32 : f32 to vector<32x128xf32>
      %c0_33 = arith.constant 0 : index
      %c0_34 = arith.constant 0 : index
      %48 = vector.load %arg7[%c0_33, %c0_34] : memref<32x128xf32, #tpu.memory_space<vmem>>, vector<32x128xf32>
      tpu.vector_store %arg7[%c0_33, %c0_34], %47 {strides = array<i32>} : memref<32x128xf32, #tpu.memory_space<vmem>>, vector<32x128xf32>,
      %cst_35 = arith.constant 0.000000e+00 : f32
      %49 = vector.broadcast %cst_35 : f32 to vector<32x128xf32>
      %c0_36 = arith.constant 0 : index
      %c0_37 = arith.constant 0 : index
      %50 = vector.load %arg8[%c0_36, %c0_37] : memref<32x128xf32, #tpu.memory_space<vmem>>, vector<32x128xf32>
      tpu.vector_store %arg8[%c0_36, %c0_37], %49 {strides = array<i32>} : memref<32x128xf32, #tpu.memory_space<vmem>>, vector<32x128xf32>,
      %cst_38 = arith.constant 0.000000e+00 : f32
      %51 = vector.broadcast %cst_38 : f32 to vector<32x128xf32>
      %c0_39 = arith.constant 0 : index
      %c0_40 = arith.constant 0 : index
      %52 = vector.load %arg9[%c0_39, %c0_40] : memref<32x128xf32, #tpu.memory_space<vmem>>, vector<32x128xf32>
      tpu.vector_store %arg9[%c0_39, %c0_40], %51 {strides = array<i32>} : memref<32x128xf32, #tpu.memory_space<vmem>>, vector<32x128xf32>,
    } else {
    }
    %c0 = arith.constant 0 : index
    %c0_1 = arith.constant 0 : index
    %3 = vector.load %arg2[%c0, %c0_1] : memref<32x128xf32, #tpu.memory_space<vmem>>, vector<32x128xf32>
    %c0_2 = arith.constant 0 : index
    %c0_3 = arith.constant 0 : index
    %4 = vector.load %arg3[%c0_2, %c0_3] : memref<128x128xf32, #tpu.memory_space<vmem>>, vector<128x128xf32>
    %cst = arith.constant dense<0.000000e+00> : vector<32x128xf32>
    %5 = tpu.matmul %3, %4, %cst {dimension_numbers = #tpu.dot_dimension_numbers<[1], [0], [0], [1], [0, 0, 1, 1], [], []>} : vector<32x128xf32>, vector<128x128xf32>, vector<32x128xf32> -> vector<32x128xf32>
    %cst_4 = arith.constant 14.2857141 : f32
    %6 = vector.broadcast %cst_4 : f32 to vector<32x128xf32>
    %7 = arith.mulf %5, %6 : vector<32x128xf32>
    %8 = tpu.iota {dimensions = array<i32: 1>} : vector<32x128xi32>
    %c128_i32 = arith.constant 128 : i32
    %9 = arith.muli %arg1, %c128_i32 : i32
    %10 = vector.broadcast %9 : i32 to vector<32x128xi32>
    %11 = arith.addi %8, %10 : vector<32x128xi32>
    %c24_i32 = arith.constant 24 : i32
    %12 = vector.broadcast %c24_i32 : i32 to vector<32x128xi32>
    %13 = arith.cmpi slt, %11, %12 : vector<32x128xi32>
    %cst_5 = arith.constant -1.000000e+30 : f32
    %14 = vector.broadcast %cst_5 : f32 to vector<32x128xf32>
    %15 = arith.select %13, %7, %14 : vector<32x128xi1>, vector<32x128xf32>
    %c0_6 = arith.constant 0 : index
    %c0_7 = arith.constant 0 : index
    %16 = vector.load %arg4[%c0_6, %c0_7] : memref<32x128xi8, #tpu.memory_space<vmem>>, vector<32x128xi8>
    %17 = arith.sitofp %16 : vector<32x128xi8> to vector<32x128xf32>
    %c0_8 = arith.constant 0 : index
    %c0_9 = arith.constant 0 : index
    %18 = vector.load %arg6[%c0_8, %c0_9] : memref<32x128xf32, #tpu.memory_space<vmem>>, vector<32x128xf32>
    %19 = arith.maximumf %18, %15 : vector<32x128xf32>
    %20 = arith.subf %18, %19 : vector<32x128xf32>
    %21 = math.exp %20 : vector<32x128xf32>
    %cst_10 = arith.constant 0.000000e+00 : f32
    %22 = vector.broadcast %cst_10 : f32 to vector<32x128xf32>
    %cst_11 = arith.constant 0.000000e+00 : f32
    %23 = vector.broadcast %cst_11 : f32 to vector<32x128xf32>
    %cst_12 = arith.constant 0.000000e+00 : f32
    %24 = vector.broadcast %cst_12 : f32 to vector<32x128xf32>
    %25 = arith.subf %15, %19 : vector<32x128xf32>
    %26 = math.exp %25 : vector<32x128xf32>
    %27 = arith.addf %22, %26 : vector<32x128xf32>
    %28 = arith.mulf %17, %15 : vector<32x128xf32>
    %29 = arith.addf %23, %28 : vector<32x128xf32>
    %30 = arith.addf %24, %17 : vector<32x128xf32>
    %c0_13 = arith.constant 0 : index
    %c0_14 = arith.constant 0 : index
    %31 = vector.load %arg7[%c0_13, %c0_14] : memref<32x128xf32, #tpu.memory_space<vmem>>, vector<32x128xf32>
    %32 = arith.mulf %21, %31 : vector<32x128xf32>
    %33 = arith.addf %32, %27 : vector<32x128xf32>
    %c0_15 = arith.constant 0 : index
    %c0_16 = arith.constant 0 : index
    %34 = vector.load %arg7[%c0_15, %c0_16] : memref<32x128xf32, #tpu.memory_space<vmem>>, vector<32x128xf32>
    tpu.vector_store %arg7[%c0_15, %c0_16], %33 {strides = array<i32>} : memref<32x128xf32, #tpu.memory_space<vmem>>, vector<32x128xf32>,
    %c0_17 = arith.constant 0 : index
    %c0_18 = arith.constant 0 : index
    %35 = vector.load %arg8[%c0_17, %c0_18] : memref<32x128xf32, #tpu.memory_space<vmem>>, vector<32x128xf32>
    %36 = arith.addf %35, %29 : vector<32x128xf32>
    %c0_19 = arith.constant 0 : index
    %c0_20 = arith.constant 0 : index
    %37 = vector.load %arg8[%c0_19, %c0_20] : memref<32x128xf32, #tpu.memory_space<vmem>>, vector<32x128xf32>
    tpu.vector_store %arg8[%c0_19, %c0_20], %36 {strides = array<i32>} : memref<32x128xf32, #tpu.memory_space<vmem>>, vector<32x128xf32>,
    %c0_21 = arith.constant 0 : index
    %c0_22 = arith.constant 0 : index
    %38 = vector.load %arg9[%c0_21, %c0_22] : memref<32x128xf32, #tpu.memory_space<vmem>>, vector<32x128xf32>
    %39 = arith.addf %38, %30 : vector<32x128xf32>
    %c0_23 = arith.constant 0 : index
    %c0_24 = arith.constant 0 : index
    %40 = vector.load %arg9[%c0_23, %c0_24] : memref<32x128xf32, #tpu.memory_space<vmem>>, vector<32x128xf32>
    tpu.vector_store %arg9[%c0_23, %c0_24], %39 {strides = array<i32>} : memref<32x128xf32, #tpu.memory_space<vmem>>, vector<32x128xf32>,
    %c0_25 = arith.constant 0 : index
    %c0_26 = arith.constant 0 : index
    %41 = vector.load %arg6[%c0_25, %c0_26] : memref<32x128xf32, #tpu.memory_space<vmem>>, vector<32x128xf32>
    tpu.vector_store %arg6[%c0_25, %c0_26], %19 {strides = array<i32>} : memref<32x128xf32, #tpu.memory_space<vmem>>, vector<32x128xf32>,
    %c0_i32_27 = arith.constant 0 : i32
    %42 = arith.cmpi eq, %arg1, %c0_i32_27 : i32
    %43 = arith.extui %42 : i1 to i32
    %c0_i32_28 = arith.constant 0 : i32
    %44 = arith.cmpi ne, %43, %c0_i32_28 : i32
    scf.if %44 {
      %c0_29 = arith.constant 0 : index
      %c0_30 = arith.constant 0 : index
      %45 = vector.load %arg6[%c0_29, %c0_30] : memref<32x128xf32, #tpu.memory_space<vmem>>, vector<32x128xf32>
      %cst_31 = arith.constant dense<0xFF800000> : vector<32xf32>
      %46 = vector.multi_reduction <maximumf>, %45, %cst_31 [1] : vector<32x128xf32> to vector<32xf32>
      %47 = vector.shape_cast %46 : vector<32xf32> to vector<32x1xf32>
      %c0_32 = arith.constant 0 : index
      %c0_33 = arith.constant 0 : index
      %48 = vector.load %arg7[%c0_32, %c0_33] : memref<32x128xf32, #tpu.memory_space<vmem>>, vector<32x128xf32>
      %49 = vector.broadcast %47 : vector<32x1xf32> to vector<32x128xf32>
      %50 = arith.subf %45, %49 : vector<32x128xf32>
      %51 = math.exp %50 : vector<32x128xf32>
      %52 = arith.mulf %48, %51 : vector<32x128xf32>
      %cst_34 = arith.constant dense<0.000000e+00> : vector<32xf32>
      %53 = vector.multi_reduction <add>, %52, %cst_34 [1] : vector<32x128xf32> to vector<32xf32>
      %54 = vector.shape_cast %53 : vector<32xf32> to vector<32x1xf32>
      %c0_35 = arith.constant 0 : index
      %c0_36 = arith.constant 0 : index
      %55 = vector.load %arg8[%c0_35, %c0_36] : memref<32x128xf32, #tpu.memory_space<vmem>>, vector<32x128xf32>
      %cst_37 = arith.constant dense<0.000000e+00> : vector<32xf32>
      %56 = vector.multi_reduction <add>, %55, %cst_37 [1] : vector<32x128xf32> to vector<32xf32>
      %57 = vector.shape_cast %56 : vector<32xf32> to vector<32x1xf32>
      %c0_38 = arith.constant 0 : index
      %c0_39 = arith.constant 0 : index
      %58 = vector.load %arg9[%c0_38, %c0_39] : memref<32x128xf32, #tpu.memory_space<vmem>>, vector<32x128xf32>
      %cst_40 = arith.constant dense<0.000000e+00> : vector<32xf32>
      %59 = vector.multi_reduction <add>, %58, %cst_40 [1] : vector<32x128xf32> to vector<32xf32>
      %60 = vector.shape_cast %59 : vector<32xf32> to vector<32x1xf32>
      %cst_41 = arith.constant 9.99999996E-13 : f32
      %61 = vector.broadcast %cst_41 : f32 to vector<32x1xf32>
      %62 = arith.addf %54, %61 : vector<32x1xf32>
      %63 = math.log %62 : vector<32x1xf32>
      %64 = arith.addf %47, %63 : vector<32x1xf32>
      %65 = arith.mulf %60, %64 : vector<32x1xf32>
      %66 = arith.subf %57, %65 : vector<32x1xf32>
      %cst_42 = arith.constant 9.99999996E-13 : f32
      %67 = vector.broadcast %cst_42 : f32 to vector<32x1xf32>
      %68 = arith.addf %60, %67 : vector<32x1xf32>
      %69 = arith.divf %66, %68 : vector<32x1xf32>
      %cst_43 = arith.constant -1.000000e+00 : f32
      %70 = vector.broadcast %cst_43 : f32 to vector<32x1xf32>
      %71 = arith.mulf %70, %69 : vector<32x1xf32>
      %c0_44 = arith.constant 0 : index
      %c0_45 = arith.constant 0 : index
      %72 = vector.load %arg5[%c0_44, %c0_45] : memref<32x1xf32, #tpu.memory_space<vmem>>, vector<32x1xf32>
      tpu.vector_store %arg5[%c0_44, %c0_45], %71 {strides = array<i32>} : memref<32x1xf32, #tpu.memory_space<vmem>>, vector<32x1xf32>,
    } else {
    }
    return
  }
  func.func @transform_0(%arg0: i32, %arg1: i32) -> (i32, i32) {
    %c0_i32 = arith.constant 0 : i32
    %c0_i32_0 = arith.constant 0 : i32
    return %arg0, %c0_i32 : i32, i32
  }
  func.func @transform_1(%arg0: i32, %arg1: i32) -> (i32, i32) {
    %c0_i32 = arith.constant 0 : i32
    %c0_i32_0 = arith.constant 0 : i32
    return %c0_i32, %arg1 : i32, i32
  }
  func.func @transform_2(%arg0: i32, %arg1: i32) -> (i32, i32) {
    %c0_i32 = arith.constant 0 : i32
    return %arg0, %arg1 : i32, i32
  }
  func.func @transform_3(%arg0: i32, %arg1: i32) -> (i32, i32) {
    %c0_i32 = arith.constant 0 : i32
    %c0_i32_0 = arith.constant 0 : i32
    return %arg0, %c0_i32 : i32, i32
  }
}

</mosaic_0001>

<bundles_post_ra>
// kernel: tpu_custom_call.1
= control target key start
LH: loop header
LB: loop body
LE: loop exit
PB: predicated region body
PF: predicated region fallthrough
CT: control target
= control target key end

     0   :  { %8 = vsyncpa [#allocation7], 0  ;;  %s755_s0 = inlined_call_operand.hbm [shape: f32[32,128], index: 0, kind: input, shape index: {}]   ;;  %s756_s1 = inlined_call_operand.hbm [shape: f32[128,128], index: 1, kind: input, shape index: {}]   ;;  %s757_s2 = inlined_call_operand.hbm [shape: s8[32,128], index: 2, kind: input, shape index: {}]   ;;  %s758_s3 = inlined_call_operand.vmem [shape: f32[32,1], index: 3, kind: output, shape index: {}]  }
   0x1   :  { %9 = vsyncpa [#allocation9], 0  ;;  %s27_s14 = sshll.u32 %s756_s1, 4  ;;  %s582_s15 = smov [#allocation8]   ;;  %s28_s14 = int_to_ptr.hbm [resolvable:$true] %s27_s14 }
   0x2   :  { %s29_s16 = sshll.u32 %s582_s15, 4  ;;  %s14_s19 = sshll.u32 %s755_s0, 4  ;;  %s30_s16 = int_to_ptr.vmem [resolvable:$true] %s29_s16  ;;  %s15_s19 = int_to_ptr.hbm [resolvable:$true] %s14_s19 }
   0x3   :  { %s583_s20 = smov 128   ;;  %s584_s21 = smov 8  }
   0x4   :  { %35 = dma.hbm_to_vmem [thread:$0]  %s28_s14, 2048, %s30_s16, [#allocation9], %s583_s20, %s583_s20, %s584_s21  }
   0x5   :  { %s585_s22 = smov [#allocation6]   ;;  %s41_s26 = sshll.u32 %s757_s2, 4  ;;  %s42_s26 = int_to_ptr.hbm [resolvable:$true] %s41_s26 }
   0x6   :  { %s16_s23 = sshll.u32 %s585_s22, 4  ;;  %s586_s1 = smov [#allocation10]   ;;  %s17_s23 = int_to_ptr.vmem [resolvable:$true] %s16_s23 }
   0x7   :  { %22 = dma.hbm_to_vmem [thread:$0]  %s15_s19, 512, %s17_s23, [#allocation7], %s583_s20, %s583_s20, %s584_s21  }
   0x8   :  { %s43_s27 = sshll.u32 %s586_s1, 4  ;;  %s44_s27 = int_to_ptr.vmem [resolvable:$true] %s43_s27 }
   0x9   :  { %46 = dma.hbm_to_vmem [thread:$0]  %s42_s26, 128, %s44_s27, [#allocation9]  }
   0xa   :  { %578 = dma.done.wait [#allocation7], 512  }
   0xb   :  { %579 = vsyncadd [#allocation7], 4294966784 }
   0xc   :  { %580 = dma.done.wait [#allocation9], 2176  }
   0xd   :  { %581 = vsyncadd [#allocation9], 4294965120  ;;  %v98_v0 = vld [vmem:[#allocation8 + $0x78] sm:$0xff]  ;;  %v97_v1 = vld [vmem:[#allocation8 + $0x70] sm:$0xff]  ;;  %v132_v25 = vlaneseq  ;;  %vm402_vm11 = vcmask 7168  }
   0xe   :  { %99 = vmatpush.msra.mxu0 %v98_v0  ;;  %414 = vmatpush.msra.mxu2 %v98_v0  ;;  %v96_v2 = vld [vmem:[#allocation8 + $0x68] sm:$0xff]  ;;  %v95_v3 = vld [vmem:[#allocation8 + $0x60] sm:$0xff]  ;;  %v94_v4 = vld [vmem:[#allocation8 + $0x58] sm:$0xff] }
   0xf   :  { %415 = vmatpush.msra.mxu3 %v98_v0  ;;  %413 = vmatpush.msra.mxu1 %v98_v0  ;;  %v93_v5 = vld [vmem:[#allocation8 + $0x50] sm:$0xff]  ;;  %v92_v6 = vld [vmem:[#allocation8 + $0x48] sm:$0xff]  ;;  %v91_v7 = vld [vmem:[#allocation8 + $0x40] sm:$0xff]  ;;  %v133_v26 = vand.u32 127, %v132_v25 }
  0x10   :  { %100 = vmatpush.msra.mxu0 %v97_v1  ;;  %417 = vmatpush.msra.mxu2 %v97_v1  ;;  %v90_v8 = vld [vmem:[#allocation8 + $0x38] sm:$0xff]  ;;  %v89_v9 = vld [vmem:[#allocation8 + $0x30] sm:$0xff]  ;;  %v88_v10 = vld [vmem:[#allocation8 + $0x28] sm:$0xff] }
  0x11   :  { %418 = vmatpush.msra.mxu3 %v97_v1  ;;  %416 = vmatpush.msra.mxu1 %v97_v1  ;;  %v87_v11 = vld [vmem:[#allocation8 + $0x20] sm:$0xff]  ;;  %v86_v12 = vld [vmem:[#allocation8 + $0x18] sm:$0xff]  ;;  %v85_v13 = vld [vmem:[#allocation8 + $0x10] sm:$0xff]  ;;  %vm137_vm0 = vcmp.lt.s32.totalorder %v133_v26, 24 }
  0x12   :  { %101 = vmatpush.msra.mxu0 %v96_v2  ;;  %420 = vmatpush.msra.mxu2 %v96_v2  ;;  %v84_v14 = vld [vmem:[#allocation8 + $0x8] sm:$0xff]  ;;  %v83_v15 = vld [vmem:[#allocation8] sm:$0xff]  ;;  %v81_v17 = vld [vmem:[#allocation6 + $0x10] sm:$0xff] }
  0x13   :  { %421 = vmatpush.msra.mxu3 %v96_v2  ;;  %419 = vmatpush.msra.mxu1 %v96_v2  ;;  %v79_v16 = vld [vmem:[#allocation6] sm:$0xff]  ;;  %v82_v18 = vld [vmem:[#allocation6 + $0x18] sm:$0xff]  ;;  %v80_v19 = vld [vmem:[#allocation6 + $0x8] sm:$0xff] }
  0x14   :  { %102 = vmatpush.msra.mxu0 %v95_v3  ;;  %423 = vmatpush.msra.mxu2 %v95_v3  ;;  %v142_v20 = vld [vmem:[#allocation10] sm:$0xff] }
  0x15   :  { %424 = vmatpush.msra.mxu3 %v95_v3  ;;  %422 = vmatpush.msra.mxu1 %v95_v3  ;;  %v143_v21 = vunpack.c.0.s8 %v142_v20  ;;  %v144_v23 = vunpack.c.1.s8 %v142_v20  ;;  %v145_v32 = vunpack.c.2.s8 %v142_v20  ;;  %v146_v36 = vunpack.c.3.s8 %v142_v20 }
  0x16   :  { %103 = vmatpush.msra.mxu0 %v94_v4  ;;  %426 = vmatpush.msra.mxu2 %v94_v4 }
  0x17   :  { %427 = vmatpush.msra.mxu3 %v94_v4  ;;  %425 = vmatpush.msra.mxu1 %v94_v4  ;;  %v147_v22 = vcvt.s32.f32 %v143_v21  ;;  %v148_v24 = vcvt.s32.f32 %v144_v23  ;;  %v149_v40 = vcvt.s32.f32 %v145_v32  ;;  %v150_v44 = vcvt.s32.f32 %v146_v36 }
  0x18   :  { %104 = vmatpush.msra.mxu0 %v93_v5  ;;  %429 = vmatpush.msra.mxu2 %v93_v5 }
  0x19   :  { %430 = vmatpush.msra.mxu3 %v93_v5  ;;  %428 = vmatpush.msra.mxu1 %v93_v5 }
  0x1a   :  { %105 = vmatpush.msra.mxu0 %v92_v6  ;;  %432 = vmatpush.msra.mxu2 %v92_v6 }
  0x1b   :  { %433 = vmatpush.msra.mxu3 %v92_v6  ;;  %431 = vmatpush.msra.mxu1 %v92_v6 }
  0x1c   :  { %106 = vmatpush.msra.mxu0 %v91_v7  ;;  %435 = vmatpush.msra.mxu2 %v91_v7 }
  0x1d   :  { %436 = vmatpush.msra.mxu3 %v91_v7  ;;  %434 = vmatpush.msra.mxu1 %v91_v7 }
  0x1e   :  { %107 = vmatpush.msra.mxu0 %v90_v8  ;;  %438 = vmatpush.msra.mxu2 %v90_v8 }
  0x1f   :  { %439 = vmatpush.msra.mxu3 %v90_v8  ;;  %437 = vmatpush.msra.mxu1 %v90_v8 }
  0x20   :  { %108 = vmatpush.msra.mxu0 %v89_v9  ;;  %441 = vmatpush.msra.mxu2 %v89_v9 }
  0x21   :  { %442 = vmatpush.msra.mxu3 %v89_v9  ;;  %440 = vmatpush.msra.mxu1 %v89_v9 }
  0x22   :  { %109 = vmatpush.msra.mxu0 %v88_v10  ;;  %444 = vmatpush.msra.mxu2 %v88_v10 }
  0x23   :  { %445 = vmatpush.msra.mxu3 %v88_v10  ;;  %443 = vmatpush.msra.mxu1 %v88_v10 }
  0x24   :  { %110 = vmatpush.msra.mxu0 %v87_v11  ;;  %447 = vmatpush.msra.mxu2 %v87_v11 }
  0x25   :  { %448 = vmatpush.msra.mxu3 %v87_v11  ;;  %446 = vmatpush.msra.mxu1 %v87_v11 }
  0x26   :  { %111 = vmatpush.msra.mxu0 %v86_v12  ;;  %450 = vmatpush.msra.mxu2 %v86_v12 }
  0x27   :  { %451 = vmatpush.msra.mxu3 %v86_v12  ;;  %449 = vmatpush.msra.mxu1 %v86_v12 }
  0x28   :  { %112 = vmatpush.msra.mxu0 %v85_v13  ;;  %453 = vmatpush.msra.mxu2 %v85_v13 }
  0x29   :  { %454 = vmatpush.msra.mxu3 %v85_v13  ;;  %452 = vmatpush.msra.mxu1 %v85_v13 }
  0x2a   :  { %113 = vmatpush.msra.mxu0 %v84_v14  ;;  %456 = vmatpush.msra.mxu2 %v84_v14 }
  0x2b   :  { %457 = vmatpush.msra.mxu3 %v84_v14  ;;  %455 = vmatpush.msra.mxu1 %v84_v14 }
  0x2c   :  { %114 = vmatpush.msra.mxu0 %v83_v15  ;;  %459 = vmatpush.msra.mxu2 %v83_v15 }
  0x2d   :  { %115 = vmatmul.f32.vlgmr.msra.gmra.mxu0 %v79_v16  ;;  %121 = vmatmul.f32.vlgmr.msra.gmra.mxu2 %v81_v17 }
  0x2e   :  { %460 = vmatpush.msra.mxu3 %v83_v15  ;;  %458 = vmatpush.msra.mxu1 %v83_v15 }
  0x2f   :  { %124 = vmatmul.f32.vlgmr.msra.gmra.mxu3 %v82_v18  ;;  %118 = vmatmul.f32.vlgmr.msra.gmra.mxu1 %v80_v19 }
  0x30   :  { %302 = vadd.xlane.f32.xlu2 %v147_v22 }
  0x38   :  { %304 = vadd.xlane.f32.xlu2 %v148_v24 }
  0xaa   :  { %v116_v27 = vpop.f32.mrf.mxu0 }
  0xab   :  { %v128_v28 = vmul.f32 14.285714, %v116_v27 }
  0xac   :  { %v119_v29 = vpop.f32.mrf.mxu1 }
  0xad   :  { %v138_v30 = vsel %vm137_vm0, %v128_v28, -1e+30  ;;  %v129_v31 = vmul.f32 14.285714, %v119_v29 }
  0xae   :  { %v155_v33 = vmax.f32 %v138_v30, -1e+30  ;;  %v617_v34 = vmul.f32 %v147_v22, %v138_v30 }
  0xaf   :  { %v139_v35 = vsel %vm137_vm0, %v129_v31, -1e+30 }
  0xb0   :  { %v122_v37 = vpop.f32.mrf.mxu2  ;;  %250 = vmax.xlane.f32.xlu0 %v155_v33  ;;  %v620_v38 = vmul.f32 %v148_v24, %v139_v35  ;;  %v156_v46 = vmax.f32 %v139_v35, -1e+30  ;;  %v159_v51 = vsub.f32 -1e+30, %v155_v33  ;;  %v171_v52 = vsub.f32 %v138_v30, %v155_v33 }
  0xb1   :  { %v130_v39 = vmul.f32 14.285714, %v122_v37 }
  0xb2   :  { %v125_v41 = vpop.f32.mrf.mxu3  ;;  %v163_v53 = vmul.f32 1.442695, %v159_v51  ;;  %v160_v55 = vsub.f32 -1e+30, %v156_v46  ;;  %v175_v56 = vmul.f32 1.442695, %v171_v52  ;;  %v172_v58 = vsub.f32 %v139_v35, %v156_v46 }
  0xb3   :  { %v140_v42 = vsel %vm137_vm0, %v130_v39, -1e+30  ;;  %v131_v43 = vmul.f32 14.285714, %v125_v41  ;;  %v303_v41 = vpop.xlane.xlu2 %302 }
  0xb4   :  { %v157_v45 = vmax.f32 %v140_v42, -1e+30  ;;  %v623_v47 = vmul.f32 %v149_v40, %v140_v42  ;;  %466 = vpow2.f32 %v163_v53  ;;  %v165_v60 = vmul.f32 1.442695, %v160_v55 }
  0xb5   :  { %v141_v48 = vsel %vm137_vm0, %v131_v43, -1e+30  ;;  %468 = vpow2.f32 %v175_v56  ;;  %v177_v2 = vmul.f32 1.442695, %v172_v58 }
  0xb6   :  { %254 = vmax.xlane.f32.xlu1 %v157_v45  ;;  %v626_v49 = vmul.f32 %v150_v44, %v141_v48  ;;  %v158_v50 = vmax.f32 %v141_v48, -1e+30  ;;  %v161_v54 = vsub.f32 -1e+30, %v157_v45  ;;  %v173_v61 = vsub.f32 %v140_v42, %v157_v45 }
  0xb7   :  { %v334_v42 = vadd.f32 1e-12, %v303_v41 }
  0xb8   :  { %252 = vmax.xlane.f32.xlu0 %v156_v46  ;;  %v167_v57 = vmul.f32 1.442695, %v161_v54  ;;  %v162_v63 = vsub.f32 -1e+30, %v158_v50  ;;  %v179_v3 = vmul.f32 1.442695, %v173_v61  ;;  %v174_v8 = vsub.f32 %v141_v48, %v158_v50 }
  0xb9   :  { %vm343_vm1 = vweird.f32 %v334_v42 }
  0xba   :  { %v467_v0 = vpop.eup %466  ;;  %470 = vpow2.f32 %v167_v57  ;;  %v169_v6 = vmul.f32 1.442695, %v162_v63  ;;  %v181_v17 = vmul.f32 1.442695, %v174_v8 }
  0xbb   :  { %472 = vpow2.f32 %v165_v60  ;;  %v203_v5 = vmul.f32 0.0, %v467_v0  ;;  %v469_v7 = vpop.eup %468  ;;  %v644_v43 = vpop.xlane.xlu2 %304  ;;  %v349_v0 = vand.u32 2147483648, %v334_v42 }
  0xbd   :  { %v207_v15 = vadd.f32 %v469_v7, %v203_v5 }
  0xbe   :  { %256 = vmax.xlane.f32.xlu1 %v158_v50 }
  0xc0   :  { %306 = vadd.xlane.f32.xlu0 %v149_v40  ;;  %v471_v11 = vpop.eup %470 }
  0xc1   :  { %v473_v14 = vpop.eup %472  ;;  %v205_v20 = vmul.f32 0.0, %v471_v11 }
  0xc2   :  { %v204_v23 = vmul.f32 0.0, %v473_v14  ;;  %v350_v14 = vor.u32 1.1754944e-38, %v349_v0 }
  0xc6   :  { %308 = vadd.xlane.f32.xlu1 %v150_v44 }
 0x123   :  { %v628_v59 = vpop.xlane.xlu0 %250 }
 0x124   :  { %v262_v62 = vsub.f32 %v155_v33, %v628_v59 }
 0x126   :  { %v266_v1 = vmul.f32 1.442695, %v262_v62 }
 0x128   :  { %474 = vpow2.f32 %v266_v1 }
 0x129   :  { %v631_v4 = vpop.xlane.xlu1 %254  ;;  %476 = vpow2.f32 %v177_v2 }
 0x12a   :  { %v264_v9 = vsub.f32 %v157_v45, %v631_v4  ;;  %478 = vpow2.f32 %v179_v3  ;;  %v649_v45 = vadd.f32 1e-12, %v644_v43  ;;  %v347_v3 = vand.u32 2147483647, %v334_v42 }
 0x12b   :  { %v634_v10 = vpop.xlane.xlu0 %252  ;;  %480 = vpow2.f32 %v169_v6 }
 0x12c   :  { %v270_v12 = vmul.f32 1.442695, %v264_v9  ;;  %v263_v13 = vsub.f32 %v156_v46, %v634_v10  ;;  %vm689_vm4 = vcmp.eq.f32.partialorder %v347_v3, 8.507059e+37  ;;  %vm358_vm5 = vweird.f32 %v649_v45 }
 0x12e   :  { %v475_v16 = vpop.eup %474  ;;  %482 = vpow2.f32 %v270_v12  ;;  %v268_v18 = vmul.f32 1.442695, %v263_v13 }
 0x12f   :  { %v274_v19 = vmul.f32 %v475_v16, %v207_v15  ;;  %v477_v21 = vpop.eup %476  ;;  %v364_v16 = vand.u32 2147483648, %v649_v45 }
 0x130   :  { %484 = vpow2.f32 %v268_v18  ;;  %v479_v24 = vpop.eup %478  ;;  %v208_v31 = vadd.f32 %v477_v21, %v204_v23 }
 0x131   :  { %v637_v22 = vpop.xlane.xlu1 %256  ;;  %278 = vadd.xlane.f32.xlu2 %v274_v19  ;;  %486 = vpow2.f32 %v181_v17  ;;  %v481_v26 = vpop.eup %480  ;;  %v209_v27 = vadd.f32 %v479_v24, %v205_v20 }
 0x132   :  { %v265_v25 = vsub.f32 %v158_v50, %v637_v22  ;;  %v206_v35 = vmul.f32 0.0, %v481_v26 }
 0x133   :  { %v646_v44 = vpop.xlane.xlu0 %306 }
 0x134   :  { %v483_v28 = vpop.eup %482  ;;  %v272_v29 = vmul.f32 1.442695, %v265_v25  ;;  %v652_v46 = vadd.f32 1e-12, %v646_v44 }
 0x135   :  { %v276_v30 = vmul.f32 %v483_v28, %v209_v27 }
 0x136   :  { %v485_v32 = vpop.eup %484  ;;  %488 = vpow2.f32 %v272_v29  ;;  %vm373_vm7 = vweird.f32 %v652_v46  ;;  %v379_v25 = vand.u32 2147483648, %v652_v46 }
 0x137   :  { %282 = vadd.xlane.f32.xlu1 %v276_v30  ;;  %v275_v33 = vmul.f32 %v485_v32, %v208_v31  ;;  %v487_v36 = vpop.eup %486  ;;  %490 = vrcp.f32 %v334_v42  ;;  %v377_v30 = vand.u32 2147483647, %v652_v46  ;;  %v362_v32 = vand.u32 2147483647, %v649_v45 }
 0x138   :  { %v210_v37 = vadd.f32 %v487_v36, %v206_v35  ;;  %492 = vrcp.f32 %v649_v45 }
 0x139   :  { %280 = vadd.xlane.f32.xlu0 %v275_v33  ;;  %494 = vrcp.f32 %v652_v46  ;;  %vm378_vm12 = vcmp.eq.f32.partialorder %v377_v30, 8.507059e+37  ;;  %vm363_vm13 = vcmp.eq.f32.partialorder %v362_v32, 8.507059e+37 }
 0x13c   :  { %v489_v39 = vpop.eup %488 }
 0x13d   :  { %v277_v40 = vmul.f32 %v489_v39, %v210_v37  ;;  %v365_v37 = vor.u32 1.1754944e-38, %v364_v16 }
 0x13f   :  { %292 = vadd.xlane.f32.xlu1 %v620_v38  ;;  %284 = vadd.xlane.f32.xlu2 %v277_v40  ;;  %v654_v38 = vpop.eup %490 }
 0x140   :  { %v664_v51 = vpop.eup %492  ;;  %vm344_vm2 = vweird.f32 %v654_v38 }
 0x141   :  { %290 = vadd.xlane.f32.xlu0 %v617_v34  ;;  %v657_v34 = vpop.xlane.xlu1 %308  ;;  %v666_v53 = vpop.eup %494  ;;  %v354_v54 = vmul.f32 %v664_v51, %v649_v45  ;;  %vm678_vm3 = vmor %vm343_vm1, %vm344_vm2  ;;  %vm359_vm6 = vweird.f32 %v664_v51  ;;  %v380_v45 = vor.u32 1.1754944e-38, %v379_v25 }
 0x142   :  { %v662_v48 = vadd.f32 1e-12, %v657_v34  ;;  %v369_v56 = vmul.f32 %v666_v53, %v652_v46  ;;  %vm374_vm8 = vweird.f32 %v666_v53  ;;  %vm703_vm9 = vmor %vm358_vm5, %vm359_vm6 }
 0x143   :  { %v355_v62 = vsub.f32 1.0, %v354_v54  ;;  %vm717_vm10 = vmor %vm373_vm7, %vm374_vm8 }
 0x144   :  { %496 = vrcp.f32 %v662_v48  ;;  %v370_v5 = vsub.f32 1.0, %v369_v56  ;;  %vm388_vm14 = vweird.f32 %v662_v48 }
 0x145   :  { %v356_v9 = vmul.f32 %v664_v51, %v355_v62 }
 0x146   :  { %v371_v15 = vmul.f32 %v666_v53, %v370_v5 }
 0x147   :  { %294 = vadd.xlane.f32.xlu2 %v623_v47  ;;  %v339_v47 = vmul.f32 %v654_v38, %v334_v42  ;;  %v357_v23 = vadd.f32 %v664_v51, %v356_v9 }
 0x148   :  { %v372_v29 = vadd.f32 %v666_v53, %v371_v15 }
 0x149   :  { %296 = vadd.xlane.f32.xlu0 %v626_v49  ;;  %v340_v50 = vsub.f32 1.0, %v339_v47 }
 0x14a   :  { %v675_v60 = vpop.eup %496  ;;  %v376_v46 = vsel %vm717_vm10, %v666_v53, %v372_v29 }
 0x14b   :  { %v341_v55 = vmul.f32 %v654_v38, %v340_v50  ;;  %v384_v8 = vmul.f32 %v675_v60, %v662_v48  ;;  %vm389_vm15 = vweird.f32 %v675_v60 }
 0x14c   :  { %vm390_vm0 = vmor %vm388_vm14, %vm389_vm15 }
 0x14d   :  { %v342_v63 = vadd.f32 %v654_v38, %v341_v55  ;;  %v385_v20 = vsub.f32 1.0, %v384_v8  ;;  %v392_v55 = vand.u32 2147483647, %v662_v48 }
 0x14f   :  { %v346_v12 = vsel %vm678_vm3, %v654_v38, %v342_v63  ;;  %v386_v40 = vmul.f32 %v675_v60, %v385_v20  ;;  %vm393_vm1 = vcmp.eq.f32.partialorder %v392_v55, 8.507059e+37 }
 0x150   :  { %v351_v33 = vsel %vm689_vm4, %v350_v14, %v346_v12 }
 0x1a4   :  { %v279_v49 = vpop.xlane.xlu2 %278 }
 0x1a5   :  { %v310_v52 = vadd.f32 1e-12, %v279_v49 }
 0x1a7   :  { %498 = vlog2.f32 %v310_v52  ;;  %v394_v52 = vand.u32 2147483648, %v662_v48 }
 0x1a9   :  { %v395_v63 = vor.u32 1.1754944e-38, %v394_v52 }
 0x1aa   :  { %v283_v57 = vpop.xlane.xlu1 %282 }
 0x1ab   :  { %v312_v58 = vadd.f32 1e-12, %v283_v57 }
 0x1ac   :  { %v281_v61 = vpop.xlane.xlu0 %280 }
 0x1ad   :  { %v499_v1 = vpop.eup %498  ;;  %500 = vlog2.f32 %v312_v58  ;;  %v311_v2 = vadd.f32 1e-12, %v281_v61 }
 0x1ae   :  { %v315_v6 = vmul.f32 0.6931472, %v499_v1 }
 0x1af   :  { %502 = vlog2.f32 %v311_v2 }
 0x1b0   :  { %v322_v11 = vadd.f32 %v315_v6, %v628_v59 }
 0x1b2   :  { %v285_v17 = vpop.xlane.xlu2 %284  ;;  %v326_v18 = vmul.f32 %v322_v11, %v303_v41 }
 0x1b3   :  { %v501_v59 = vpop.eup %500  ;;  %v313_v19 = vadd.f32 1e-12, %v285_v17 }
 0x1b4   :  { %v319_v21 = vmul.f32 0.6931472, %v501_v59  ;;  %v291_v24 = vpop.xlane.xlu0 %290 }
 0x1b5   :  { %v503_v26 = vpop.eup %502  ;;  %504 = vlog2.f32 %v313_v19  ;;  %v330_v28 = vsub.f32 %v291_v24, %v326_v18 }
 0x1b6   :  { %v317_v31 = vmul.f32 0.6931472, %v503_v26  ;;  %v324_v35 = vadd.f32 %v319_v21, %v631_v4  ;;  %v361_v4 = vsel %vm703_vm9, %v664_v51, %v357_v23  ;;  %v387_v51 = vadd.f32 %v675_v60, %v386_v40 }
 0x1b7   :  { %v352_v39 = vmul.f32 %v351_v33, %v330_v28  ;;  %v366_v56 = vsel %vm363_vm13, %v365_v37, %v361_v4 }
 0x1b8   :  { %v323_v41 = vadd.f32 %v317_v31, %v634_v10  ;;  %v328_v42 = vmul.f32 %v324_v35, %v646_v44  ;;  %v293_v44 = vpop.xlane.xlu1 %292  ;;  %v391_v1 = vsel %vm390_vm0, %v675_v60, %v387_v51 }
 0x1b9   :  { %v398_v38 = vmul.f32 -1.0, %v352_v39  ;;  %v396_v3 = vsel %vm393_vm1, %v395_v63, %v391_v1 }
 0x1ba   :  { %v327_v47 = vmul.f32 %v323_v41, %v644_v43  ;;  %v295_v49 = vpop.xlane.xlu2 %294  ;;  %v381_v43 = vsel %vm378_vm12, %v380_v45, %v376_v46 }
 0x1bb   :  { %v505_v10 = vpop.eup %504  ;;  %403 = vst.msk [vmem:[%s758_s3] sm:$0xff] %vm402_vm11, %v398_v38  ;;  %v332_v50 = vsub.f32 %v295_v49, %v328_v42 }
 0x1bc   :  { %v331_v53 = vsub.f32 %v293_v44, %v327_v47  ;;  %v321_v54 = vmul.f32 0.6931472, %v505_v10  ;;  %v297_v48 = vpop.xlane.xlu0 %296 }
 0x1bd   :  { %v382_v57 = vmul.f32 %v381_v43, %v332_v50 }
 0x1be   :  { %v367_v58 = vmul.f32 %v366_v56, %v331_v53  ;;  %v325_v61 = vadd.f32 %v321_v54, %v637_v22 }
 0x1bf   :  { %v400_v62 = vmul.f32 -1.0, %v382_v57 }
 0x1c0   :  { %v399_v0 = vmul.f32 -1.0, %v367_v58  ;;  %v329_v2 = vmul.f32 %v325_v61, %v657_v34 }
 0x1c1   :  { %405 = vst.msk [vmem:[%s758_s3 + $0x10] sm:$0xff] %vm402_vm11, %v400_v62 }
 0x1c2   :  { %404 = vst.msk [vmem:[%s758_s3 + $0x8] sm:$0xff] %vm402_vm11, %v399_v0  ;;  %v333_v22 = vsub.f32 %v297_v48, %v329_v2 }
 0x1c4   :  { %v397_v5 = vmul.f32 %v396_v3, %v333_v22 }
 0x1c6   :  { %v401_v6 = vmul.f32 -1.0, %v397_v5 }
 0x1c8   :  { %406 = vst.msk [vmem:[%s758_s3 + $0x18] sm:$0xff] %vm402_vm11, %v401_v6 }
 0x1c9   :  { %411 = vsyncpa [#allocation7], 1 }
 0x1ca   :  { %412 = vsyncpa [#allocation9], 1 }

</bundles_post_ra>
